<compile_context>
chip_gen: v6e
topology: v6e:2x2x1
jax: 0.10.0
libtpu: 0.0.40
codegen_flags: <defaults>
</compile_context>

<pallas_src>
import jax
import jax.numpy as jnp
from jax import lax
from jax.experimental import pallas as pl
from jax.experimental.pallas import tpu as pltpu


def _round_up(x, m):
    return ((x + m - 1) // m) * m


def _make_kernel(T, Bp):
    def kernel(x2d_ref, wih_ref, whh_ref, b_ref, wcls_ref, bcls_ref,
               y_ref, gx_ref, hs_ref):
        H = hs_ref.shape[1]
        mxu_dt = whh_ref.dtype  # bf16 or f32 matmul operands; accumulation is f32

        # Hoisted input projection: one full-occupancy matmul, off the recurrence
        # critical path.  gx = x @ W_ih^T + (b_ih + b_hh), shape (T*Bp, 4H), f32.
        gx_ref[...] = (
            jnp.dot(x2d_ref[...], wih_ref[...],
                    preferred_element_type=jnp.float32)
            + b_ref[...])

        h0 = jnp.zeros((Bp, H), jnp.float32)
        c0 = jnp.zeros((Bp, H), jnp.float32)

        def step(t, carry):
            h, c = carry
            row = pl.multiple_of(t * Bp, Bp)  # sublane-aligned (Bp multiple of 8)
            # h stays in vregs; only the MXU operand is (optionally) cast to bf16.
            gates = gx_ref[pl.ds(row, Bp), :] + jnp.dot(
                h.astype(mxu_dt), whh_ref[...],
                preferred_element_type=jnp.float32)

            # PyTorch gate ordering: i, f, g, o.  One sigmoid + one tanh pass on
            # the full 128-lane gates vreg, then slice (f32 elementwise on all
            # generations; v5e has no bf16 VPU/EUP).
            sig = jax.nn.sigmoid(gates)
            tnh = jnp.tanh(gates)
            i_g = sig[:, 0 * H:1 * H]
            f_g = sig[:, 1 * H:2 * H]
            g_g = tnh[:, 2 * H:3 * H]
            o_g = sig[:, 3 * H:4 * H]

            c_new = f_g * c + i_g * g_g
            h_new = o_g * jnp.tanh(c_new)

            hs_ref[pl.ds(row, Bp), :] = h_new
            return (h_new, c_new)

        # Fully unrolled: tiny body, <~10 live vregs, removes loop induction /
        # branch overhead and exposes cross-step scheduling to the LLO scheduler.
        lax.fori_loop(0, T, step, (h0, c0), unroll=True)

        # Classifier hoisted out of the loop: one matmul over all timesteps,
        # single lane-dense store (last dim = NCp, a multiple of 128).
        y_ref[...] = (
            jnp.dot(hs_ref[...].astype(wcls_ref.dtype), wcls_ref[...],
                    preferred_element_type=jnp.float32)
            + bcls_ref[...]).astype(y_ref.dtype)

    return kernel


def lstm_classifier(x, w_ih, w_hh, b_ih, b_hh, w_cls, b_cls,
                    mxu_dtype=jnp.float32):
    """x: (T, B, I) f32.  Weights in PyTorch shapes:
       w_ih: (4H, I), w_hh: (4H, H), b_ih/b_hh: (4H,), w_cls: (NC, H), b_cls: (NC,).
       mxu_dtype: dtype of MXU matmul operands (f32 for exact parity, bf16 for
       faster matmuls on v6e/v7x; accumulation and gate math stay f32).
       Returns y: (T, B, NC) f32."""
    T, B, I = x.shape
    H4 = w_ih.shape[0]
    H = H4 // 4
    NC = w_cls.shape[0]

    Bp = max(8, _round_up(B, 8))         # pad batch to sublane multiple
    NCp = _round_up(max(NC, 1), 128)     # pad classifier out-dim to lane multiple

    # Glue (plain JAX): pad batch, flatten time*batch, pre-transpose weights,
    # combine biases, zero-pad the classifier to NCp columns, cast MXU operands.
    x_p = jnp.pad(x, ((0, 0), (0, Bp - B), (0, 0)))
    x2d = x_p.reshape(T * Bp, I).astype(mxu_dtype)
    wih_t = w_ih.T.astype(mxu_dtype)                              # (I, 4H)
    whh_t = w_hh.T.astype(mxu_dtype)                              # (H, 4H)
    b = (b_ih + b_hh).reshape(1, H4).astype(jnp.float32)          # (1, 4H) f32
    wcls_t = jnp.pad(w_cls.T, ((0, 0), (0, NCp - NC))).astype(mxu_dtype)  # (H, NCp)
    bcls = jnp.pad(b_cls, (0, NCp - NC)).reshape(1, NCp).astype(jnp.float32)

    grid_spec = pltpu.PrefetchScalarGridSpec(
        num_scalar_prefetch=0,
        grid=(1,),  # single invocation; the recurrence runs as an in-kernel loop
        in_specs=[
            pl.BlockSpec((T * Bp, I), lambda i: (0, 0)),   # x (flattened, padded)
            pl.BlockSpec((I, H4), lambda i: (0, 0)),       # W_ih^T
            pl.BlockSpec((H, H4), lambda i: (0, 0)),       # W_hh^T
            pl.BlockSpec((1, H4), lambda i: (0, 0)),       # combined LSTM bias
            pl.BlockSpec((H, NCp), lambda i: (0, 0)),      # W_cls^T (padded)
            pl.BlockSpec((1, NCp), lambda i: (0, 0)),      # b_cls (padded)
        ],
        out_specs=pl.BlockSpec((T * Bp, NCp), lambda i: (0, 0)),
        scratch_shapes=[
            pltpu.VMEM((T * Bp, H4), jnp.float32),   # gates_x (hoisted projection)
            pltpu.VMEM((T * Bp, H), jnp.float32),    # hidden states over time
        ],
    )

    y2d = pl.pallas_call(
        _make_kernel(T, Bp),
        out_shape=jax.ShapeDtypeStruct((T * Bp, NCp), jnp.float32),
        grid_spec=grid_spec,
        compiler_params=pltpu.CompilerParams(
            dimension_semantics=("arbitrary",)),
    )(x2d, wih_t, whh_t, b, wcls_t, bcls)

    return y2d.reshape(T, Bp, NCp)[:, :B, :NC]


def lstm_classifier_ref(x, w_ih, w_hh, b_ih, b_hh, w_cls, b_cls):
    """Pure-JAX reference matching PyTorch LSTM + Linear semantics."""
    T, B, I = x.shape
    H = w_hh.shape[1]

    def step(carry, x_t):
        h, c = carry
        gates = x_t @ w_ih.T + h @ w_hh.T + b_ih + b_hh
        i_g = jax.nn.sigmoid(gates[:, 0 * H:1 * H])
        f_g = jax.nn.sigmoid(gates[:, 1 * H:2 * H])
        g_g = jnp.tanh(gates[:, 2 * H:3 * H])
        o_g = jax.nn.sigmoid(gates[:, 3 * H:4 * H])
        c = f_g * c + i_g * g_g
        h = o_g * jnp.tanh(c)
        return (h, c), h

    h0 = jnp.zeros((B, H), jnp.float32)
    c0 = jnp.zeros((B, H), jnp.float32)
    _, hs = lax.scan(step, (h0, c0), x)              # (T, B, H)
    return hs @ w_cls.T + b_cls                      # (T, B, NC)


if __name__ == "__main__":
    # Small shapes consistent with the module: BaseModule(inp_channel=16, hz=32, nc=8)
    T, B, I, H, NC = 8, 4, 16, 32, 8

    key = jax.random.PRNGKey(0)
    k = jax.random.split(key, 8)

    # PyTorch default init: U(-1/sqrt(H), 1/sqrt(H)) for LSTM and Linear params.
    s = 1.0 / jnp.sqrt(jnp.float32(H))
    w_ih = jax.random.uniform(k[0], (4 * H, I), jnp.float32, -s, s)
    w_hh = jax.random.uniform(k[1], (4 * H, H), jnp.float32, -s, s)
    b_ih = jax.random.uniform(k[2], (4 * H,), jnp.float32, -s, s)
    b_hh = jax.random.uniform(k[3], (4 * H,), jnp.float32, -s, s)
    w_cls = jax.random.uniform(k[4], (NC, H), jnp.float32, -s, s)
    b_cls = jax.random.uniform(k[5], (NC,), jnp.float32, -s, s)

    x = jax.random.normal(k[6], (T, B, I), jnp.float32)

    y_ref = lstm_classifier_ref(x, w_ih, w_hh, b_ih, b_hh, w_cls, b_cls)

    # f32 MXU-operand path: exact parity with the f32 reference.
    y = lstm_classifier(x, w_ih, w_hh, b_ih, b_hh, w_cls, b_cls,
                        mxu_dtype=jnp.float32)
    y = jax.block_until_ready(y)
    assert y.shape == (T, B, NC)
    assert jnp.allclose(y, y_ref, atol=1e-5, rtol=1e-5), "f32 path mismatch vs reference"

    # bf16 MXU-operand path (recommended on v6e/v7x): f32 accumulation / cell
    # state / gate math, so only matmul-operand rounding differs -> wider tolerance.
    y_bf16 = lstm_classifier(x, w_ih, w_hh, b_ih, b_hh, w_cls, b_cls,
                             mxu_dtype=jnp.bfloat16)
    y_bf16 = jax.block_until_ready(y_bf16)
    assert y_bf16.shape == (T, B, NC)
    assert jnp.allclose(y_bf16, y_ref, atol=5e-2, rtol=5e-2), "bf16 path mismatch vs reference"

    # TODO(synk): the original PyTorch forward() is `pass` (returns None); this
    # implements the canonical LSTM->Linear forward implied by __init__.
    print("KERNEL_OK")
</pallas_src>

<mosaic_0001>
module attributes {stable_mosaic.version = 11 : i64} {
  func.func @kernel(%arg0: i32, %arg1: memref<64x16xf32, #tpu.memory_space<vmem>>, %arg2: memref<16x128xf32, #tpu.memory_space<vmem>>, %arg3: memref<32x128xf32, #tpu.memory_space<vmem>>, %arg4: memref<1x128xf32, #tpu.memory_space<vmem>>, %arg5: memref<32x128xf32, #tpu.memory_space<vmem>>, %arg6: memref<1x128xf32, #tpu.memory_space<vmem>>, %arg7: memref<64x128xf32, #tpu.memory_space<vmem>>, %arg8: memref<64x128xf32, #tpu.memory_space<vmem>>, %arg9: memref<64x32xf32, #tpu.memory_space<vmem>>) attributes {dimension_semantics = [#tpu.dimension_semantics<arbitrary>], iteration_bounds = array<i64: 1>, scalar_prefetch = 0 : i64, scratch_operands = 2 : i64, tpu.core_type = #tpu.core_type<tc>, window_params = [{pipeline_mode = #tpu.pipeline_mode<synchronous>, transform_indices = @transform_0, window_bounds = array<i64: 64, 16>}, {pipeline_mode = #tpu.pipeline_mode<synchronous>, transform_indices = @transform_1, window_bounds = array<i64: 16, 128>}, {pipeline_mode = #tpu.pipeline_mode<synchronous>, transform_indices = @transform_2, window_bounds = array<i64: 32, 128>}, {pipeline_mode = #tpu.pipeline_mode<synchronous>, transform_indices = @transform_3, window_bounds = array<i64: 1, 128>}, {pipeline_mode = #tpu.pipeline_mode<synchronous>, transform_indices = @transform_4, window_bounds = array<i64: 32, 128>}, {pipeline_mode = #tpu.pipeline_mode<synchronous>, transform_indices = @transform_5, window_bounds = array<i64: 1, 128>}, {pipeline_mode = #tpu.pipeline_mode<synchronous>, transform_indices = @transform_6, window_bounds = array<i64: 64, 128>}]} {
    %c0 = arith.constant 0 : index
    %c0_0 = arith.constant 0 : index
    %0 = vector.load %arg1[%c0, %c0_0] : memref<64x16xf32, #tpu.memory_space<vmem>>, vector<64x16xf32>
    %c0_1 = arith.constant 0 : index
    %c0_2 = arith.constant 0 : index
    %1 = vector.load %arg2[%c0_1, %c0_2] : memref<16x128xf32, #tpu.memory_space<vmem>>, vector<16x128xf32>
    %cst = arith.constant dense<0.000000e+00> : vector<64x128xf32>
    %2 = tpu.matmul %0, %1, %cst {dimension_numbers = #tpu.dot_dimension_numbers<[1], [0], [0], [1], [0, 0, 1, 1], [], []>} : vector<64x16xf32>, vector<16x128xf32>, vector<64x128xf32> -> vector<64x128xf32>
    %c0_3 = arith.constant 0 : index
    %c0_4 = arith.constant 0 : index
    %3 = vector.load %arg4[%c0_3, %c0_4] : memref<1x128xf32, #tpu.memory_space<vmem>>, vector<1x128xf32>
    %4 = vector.broadcast %3 : vector<1x128xf32> to vector<64x128xf32>
    %5 = arith.addf %2, %4 : vector<64x128xf32>
    %c0_5 = arith.constant 0 : index
    %c0_6 = arith.constant 0 : index
    %6 = vector.load %arg8[%c0_5, %c0_6] : memref<64x128xf32, #tpu.memory_space<vmem>>, vector<64x128xf32>
    tpu.vector_store %arg8[%c0_5, %c0_6], %5 {strides = array<i32>} : memref<64x128xf32, #tpu.memory_space<vmem>>, vector<64x128xf32>,
    %cst_7 = arith.constant 0.000000e+00 : f32
    %7 = vector.broadcast %cst_7 : f32 to vector<8x32xf32>
    %cst_8 = arith.constant 0.000000e+00 : f32
    %8 = vector.broadcast %cst_8 : f32 to vector<8x32xf32>
    %c0_i32 = arith.constant 0 : i32
    %c8_i32 = arith.constant 8 : i32
    %9 = arith.muli %c0_i32, %c8_i32 : i32
    %10 = tpu.assume_multiple %9, 8 : i32
    %11 = arith.index_cast %10 : i32 to index
    %c0_9 = arith.constant 0 : index
    %12 = vector.load %arg8[%11, %c0_9] : memref<64x128xf32, #tpu.memory_space<vmem>>, vector<8x128xf32>
    %c0_10 = arith.constant 0 : index
    %c0_11 = arith.constant 0 : index
    %13 = vector.load %arg3[%c0_10, %c0_11] : memref<32x128xf32, #tpu.memory_space<vmem>>, vector<32x128xf32>
    %cst_12 = arith.constant dense<0.000000e+00> : vector<8x128xf32>
    %14 = tpu.matmul %7, %13, %cst_12 {dimension_numbers = #tpu.dot_dimension_numbers<[1], [0], [0], [1], [0, 0, 1, 1], [], []>} : vector<8x32xf32>, vector<32x128xf32>, vector<8x128xf32> -> vector<8x128xf32>
    %15 = arith.addf %12, %14 : vector<8x128xf32>
    %16 = arith.negf %15 : vector<8x128xf32>
    %17 = math.exp %16 : vector<8x128xf32>
    %cst_13 = arith.constant 1.000000e+00 : f32
    %18 = vector.broadcast %cst_13 : f32 to vector<8x128xf32>
    %19 = arith.addf %18, %17 : vector<8x128xf32>
    %20 = arith.divf %18, %19 : vector<8x128xf32>
    %21 = math.tanh %15 : vector<8x128xf32>
    %22 = vector.extract_strided_slice %20 {offsets = [0, 0], sizes = [8, 32], strides = [1, 1]} : vector<8x128xf32> to vector<8x32xf32>
    %23 = vector.extract_strided_slice %20 {offsets = [0, 32], sizes = [8, 32], strides = [1, 1]} : vector<8x128xf32> to vector<8x32xf32>
    %24 = vector.extract_strided_slice %21 {offsets = [0, 64], sizes = [8, 32], strides = [1, 1]} : vector<8x128xf32> to vector<8x32xf32>
    %25 = vector.extract_strided_slice %20 {offsets = [0, 96], sizes = [8, 32], strides = [1, 1]} : vector<8x128xf32> to vector<8x32xf32>
    %26 = arith.mulf %23, %8 : vector<8x32xf32>
    %27 = arith.mulf %22, %24 : vector<8x32xf32>
    %28 = arith.addf %26, %27 : vector<8x32xf32>
    %29 = math.tanh %28 : vector<8x32xf32>
    %30 = arith.mulf %25, %29 : vector<8x32xf32>
    %31 = arith.index_cast %10 : i32 to index
    %c0_14 = arith.constant 0 : index
    %32 = vector.load %arg9[%31, %c0_14] : memref<64x32xf32, #tpu.memory_space<vmem>>, vector<8x32xf32>
    tpu.vector_store %arg9[%31, %c0_14], %30 {strides = array<i32>} : memref<64x32xf32, #tpu.memory_space<vmem>>, vector<8x32xf32>,
    %c1_i32 = arith.constant 1 : i32
    %c8_i32_15 = arith.constant 8 : i32
    %33 = arith.muli %c1_i32, %c8_i32_15 : i32
    %34 = tpu.assume_multiple %33, 8 : i32
    %35 = arith.index_cast %34 : i32 to index
    %c0_16 = arith.constant 0 : index
    %36 = vector.load %arg8[%35, %c0_16] : memref<64x128xf32, #tpu.memory_space<vmem>>, vector<8x128xf32>
    %c0_17 = arith.constant 0 : index
    %c0_18 = arith.constant 0 : index
    %37 = vector.load %arg3[%c0_17, %c0_18] : memref<32x128xf32, #tpu.memory_space<vmem>>, vector<32x128xf32>
    %cst_19 = arith.constant dense<0.000000e+00> : vector<8x128xf32>
    %38 = tpu.matmul %30, %37, %cst_19 {dimension_numbers = #tpu.dot_dimension_numbers<[1], [0], [0], [1], [0, 0, 1, 1], [], []>} : vector<8x32xf32>, vector<32x128xf32>, vector<8x128xf32> -> vector<8x128xf32>
    %39 = arith.addf %36, %38 : vector<8x128xf32>
    %40 = arith.negf %39 : vector<8x128xf32>
    %41 = math.exp %40 : vector<8x128xf32>
    %cst_20 = arith.constant 1.000000e+00 : f32
    %42 = vector.broadcast %cst_20 : f32 to vector<8x128xf32>
    %43 = arith.addf %42, %41 : vector<8x128xf32>
    %44 = arith.divf %42, %43 : vector<8x128xf32>
    %45 = math.tanh %39 : vector<8x128xf32>
    %46 = vector.extract_strided_slice %44 {offsets = [0, 0], sizes = [8, 32], strides = [1, 1]} : vector<8x128xf32> to vector<8x32xf32>
    %47 = vector.extract_strided_slice %44 {offsets = [0, 32], sizes = [8, 32], strides = [1, 1]} : vector<8x128xf32> to vector<8x32xf32>
    %48 = vector.extract_strided_slice %45 {offsets = [0, 64], sizes = [8, 32], strides = [1, 1]} : vector<8x128xf32> to vector<8x32xf32>
    %49 = vector.extract_strided_slice %44 {offsets = [0, 96], sizes = [8, 32], strides = [1, 1]} : vector<8x128xf32> to vector<8x32xf32>
    %50 = arith.mulf %47, %28 : vector<8x32xf32>
    %51 = arith.mulf %46, %48 : vector<8x32xf32>
    %52 = arith.addf %50, %51 : vector<8x32xf32>
    %53 = math.tanh %52 : vector<8x32xf32>
    %54 = arith.mulf %49, %53 : vector<8x32xf32>
    %55 = arith.index_cast %34 : i32 to index
    %c0_21 = arith.constant 0 : index
    %56 = vector.load %arg9[%55, %c0_21] : memref<64x32xf32, #tpu.memory_space<vmem>>, vector<8x32xf32>
    tpu.vector_store %arg9[%55, %c0_21], %54 {strides = array<i32>} : memref<64x32xf32, #tpu.memory_space<vmem>>, vector<8x32xf32>,
    %c2_i32 = arith.constant 2 : i32
    %c8_i32_22 = arith.constant 8 : i32
    %57 = arith.muli %c2_i32, %c8_i32_22 : i32
    %58 = tpu.assume_multiple %57, 8 : i32
    %59 = arith.index_cast %58 : i32 to index
    %c0_23 = arith.constant 0 : index
    %60 = vector.load %arg8[%59, %c0_23] : memref<64x128xf32, #tpu.memory_space<vmem>>, vector<8x128xf32>
    %c0_24 = arith.constant 0 : index
    %c0_25 = arith.constant 0 : index
    %61 = vector.load %arg3[%c0_24, %c0_25] : memref<32x128xf32, #tpu.memory_space<vmem>>, vector<32x128xf32>
    %cst_26 = arith.constant dense<0.000000e+00> : vector<8x128xf32>
    %62 = tpu.matmul %54, %61, %cst_26 {dimension_numbers = #tpu.dot_dimension_numbers<[1], [0], [0], [1], [0, 0, 1, 1], [], []>} : vector<8x32xf32>, vector<32x128xf32>, vector<8x128xf32> -> vector<8x128xf32>
    %63 = arith.addf %60, %62 : vector<8x128xf32>
    %64 = arith.negf %63 : vector<8x128xf32>
    %65 = math.exp %64 : vector<8x128xf32>
    %cst_27 = arith.constant 1.000000e+00 : f32
    %66 = vector.broadcast %cst_27 : f32 to vector<8x128xf32>
    %67 = arith.addf %66, %65 : vector<8x128xf32>
    %68 = arith.divf %66, %67 : vector<8x128xf32>
    %69 = math.tanh %63 : vector<8x128xf32>
    %70 = vector.extract_strided_slice %68 {offsets = [0, 0], sizes = [8, 32], strides = [1, 1]} : vector<8x128xf32> to vector<8x32xf32>
    %71 = vector.extract_strided_slice %68 {offsets = [0, 32], sizes = [8, 32], strides = [1, 1]} : vector<8x128xf32> to vector<8x32xf32>
    %72 = vector.extract_strided_slice %69 {offsets = [0, 64], sizes = [8, 32], strides = [1, 1]} : vector<8x128xf32> to vector<8x32xf32>
    %73 = vector.extract_strided_slice %68 {offsets = [0, 96], sizes = [8, 32], strides = [1, 1]} : vector<8x128xf32> to vector<8x32xf32>
    %74 = arith.mulf %71, %52 : vector<8x32xf32>
    %75 = arith.mulf %70, %72 : vector<8x32xf32>
    %76 = arith.addf %74, %75 : vector<8x32xf32>
    %77 = math.tanh %76 : vector<8x32xf32>
    %78 = arith.mulf %73, %77 : vector<8x32xf32>
    %79 = arith.index_cast %58 : i32 to index
    %c0_28 = arith.constant 0 : index
    %80 = vector.load %arg9[%79, %c0_28] : memref<64x32xf32, #tpu.memory_space<vmem>>, vector<8x32xf32>
    tpu.vector_store %arg9[%79, %c0_28], %78 {strides = array<i32>} : memref<64x32xf32, #tpu.memory_space<vmem>>, vector<8x32xf32>,
    %c3_i32 = arith.constant 3 : i32
    %c8_i32_29 = arith.constant 8 : i32
    %81 = arith.muli %c3_i32, %c8_i32_29 : i32
    %82 = tpu.assume_multiple %81, 8 : i32
    %83 = arith.index_cast %82 : i32 to index
    %c0_30 = arith.constant 0 : index
    %84 = vector.load %arg8[%83, %c0_30] : memref<64x128xf32, #tpu.memory_space<vmem>>, vector<8x128xf32>
    %c0_31 = arith.constant 0 : index
    %c0_32 = arith.constant 0 : index
    %85 = vector.load %arg3[%c0_31, %c0_32] : memref<32x128xf32, #tpu.memory_space<vmem>>, vector<32x128xf32>
    %cst_33 = arith.constant dense<0.000000e+00> : vector<8x128xf32>
    %86 = tpu.matmul %78, %85, %cst_33 {dimension_numbers = #tpu.dot_dimension_numbers<[1], [0], [0], [1], [0, 0, 1, 1], [], []>} : vector<8x32xf32>, vector<32x128xf32>, vector<8x128xf32> -> vector<8x128xf32>
    %87 = arith.addf %84, %86 : vector<8x128xf32>
    %88 = arith.negf %87 : vector<8x128xf32>
    %89 = math.exp %88 : vector<8x128xf32>
    %cst_34 = arith.constant 1.000000e+00 : f32
    %90 = vector.broadcast %cst_34 : f32 to vector<8x128xf32>
    %91 = arith.addf %90, %89 : vector<8x128xf32>
    %92 = arith.divf %90, %91 : vector<8x128xf32>
    %93 = math.tanh %87 : vector<8x128xf32>
    %94 = vector.extract_strided_slice %92 {offsets = [0, 0], sizes = [8, 32], strides = [1, 1]} : vector<8x128xf32> to vector<8x32xf32>
    %95 = vector.extract_strided_slice %92 {offsets = [0, 32], sizes = [8, 32], strides = [1, 1]} : vector<8x128xf32> to vector<8x32xf32>
    %96 = vector.extract_strided_slice %93 {offsets = [0, 64], sizes = [8, 32], strides = [1, 1]} : vector<8x128xf32> to vector<8x32xf32>
    %97 = vector.extract_strided_slice %92 {offsets = [0, 96], sizes = [8, 32], strides = [1, 1]} : vector<8x128xf32> to vector<8x32xf32>
    %98 = arith.mulf %95, %76 : vector<8x32xf32>
    %99 = arith.mulf %94, %96 : vector<8x32xf32>
    %100 = arith.addf %98, %99 : vector<8x32xf32>
    %101 = math.tanh %100 : vector<8x32xf32>
    %102 = arith.mulf %97, %101 : vector<8x32xf32>
    %103 = arith.index_cast %82 : i32 to index
    %c0_35 = arith.constant 0 : index
    %104 = vector.load %arg9[%103, %c0_35] : memref<64x32xf32, #tpu.memory_space<vmem>>, vector<8x32xf32>
    tpu.vector_store %arg9[%103, %c0_35], %102 {strides = array<i32>} : memref<64x32xf32, #tpu.memory_space<vmem>>, vector<8x32xf32>,
    %c4_i32 = arith.constant 4 : i32
    %c8_i32_36 = arith.constant 8 : i32
    %105 = arith.muli %c4_i32, %c8_i32_36 : i32
    %106 = tpu.assume_multiple %105, 8 : i32
    %107 = arith.index_cast %106 : i32 to index
    %c0_37 = arith.constant 0 : index
    %108 = vector.load %arg8[%107, %c0_37] : memref<64x128xf32, #tpu.memory_space<vmem>>, vector<8x128xf32>
    %c0_38 = arith.constant 0 : index
    %c0_39 = arith.constant 0 : index
    %109 = vector.load %arg3[%c0_38, %c0_39] : memref<32x128xf32, #tpu.memory_space<vmem>>, vector<32x128xf32>
    %cst_40 = arith.constant dense<0.000000e+00> : vector<8x128xf32>
    %110 = tpu.matmul %102, %109, %cst_40 {dimension_numbers = #tpu.dot_dimension_numbers<[1], [0], [0], [1], [0, 0, 1, 1], [], []>} : vector<8x32xf32>, vector<32x128xf32>, vector<8x128xf32> -> vector<8x128xf32>
    %111 = arith.addf %108, %110 : vector<8x128xf32>
    %112 = arith.negf %111 : vector<8x128xf32>
    %113 = math.exp %112 : vector<8x128xf32>
    %cst_41 = arith.constant 1.000000e+00 : f32
    %114 = vector.broadcast %cst_41 : f32 to vector<8x128xf32>
    %115 = arith.addf %114, %113 : vector<8x128xf32>
    %116 = arith.divf %114, %115 : vector<8x128xf32>
    %117 = math.tanh %111 : vector<8x128xf32>
    %118 = vector.extract_strided_slice %116 {offsets = [0, 0], sizes = [8, 32], strides = [1, 1]} : vector<8x128xf32> to vector<8x32xf32>
    %119 = vector.extract_strided_slice %116 {offsets = [0, 32], sizes = [8, 32], strides = [1, 1]} : vector<8x128xf32> to vector<8x32xf32>
    %120 = vector.extract_strided_slice %117 {offsets = [0, 64], sizes = [8, 32], strides = [1, 1]} : vector<8x128xf32> to vector<8x32xf32>
    %121 = vector.extract_strided_slice %116 {offsets = [0, 96], sizes = [8, 32], strides = [1, 1]} : vector<8x128xf32> to vector<8x32xf32>
    %122 = arith.mulf %119, %100 : vector<8x32xf32>
    %123 = arith.mulf %118, %120 : vector<8x32xf32>
    %124 = arith.addf %122, %123 : vector<8x32xf32>
    %125 = math.tanh %124 : vector<8x32xf32>
    %126 = arith.mulf %121, %125 : vector<8x32xf32>
    %127 = arith.index_cast %106 : i32 to index
    %c0_42 = arith.constant 0 : index
    %128 = vector.load %arg9[%127, %c0_42] : memref<64x32xf32, #tpu.memory_space<vmem>>, vector<8x32xf32>
    tpu.vector_store %arg9[%127, %c0_42], %126 {strides = array<i32>} : memref<64x32xf32, #tpu.memory_space<vmem>>, vector<8x32xf32>,
    %c5_i32 = arith.constant 5 : i32
    %c8_i32_43 = arith.constant 8 : i32
    %129 = arith.muli %c5_i32, %c8_i32_43 : i32
    %130 = tpu.assume_multiple %129, 8 : i32
    %131 = arith.index_cast %130 : i32 to index
    %c0_44 = arith.constant 0 : index
    %132 = vector.load %arg8[%131, %c0_44] : memref<64x128xf32, #tpu.memory_space<vmem>>, vector<8x128xf32>
    %c0_45 = arith.constant 0 : index
    %c0_46 = arith.constant 0 : index
    %133 = vector.load %arg3[%c0_45, %c0_46] : memref<32x128xf32, #tpu.memory_space<vmem>>, vector<32x128xf32>
    %cst_47 = arith.constant dense<0.000000e+00> : vector<8x128xf32>
    %134 = tpu.matmul %126, %133, %cst_47 {dimension_numbers = #tpu.dot_dimension_numbers<[1], [0], [0], [1], [0, 0, 1, 1], [], []>} : vector<8x32xf32>, vector<32x128xf32>, vector<8x128xf32> -> vector<8x128xf32>
    %135 = arith.addf %132, %134 : vector<8x128xf32>
    %136 = arith.negf %135 : vector<8x128xf32>
    %137 = math.exp %136 : vector<8x128xf32>
    %cst_48 = arith.constant 1.000000e+00 : f32
    %138 = vector.broadcast %cst_48 : f32 to vector<8x128xf32>
    %139 = arith.addf %138, %137 : vector<8x128xf32>
    %140 = arith.divf %138, %139 : vector<8x128xf32>
    %141 = math.tanh %135 : vector<8x128xf32>
    %142 = vector.extract_strided_slice %140 {offsets = [0, 0], sizes = [8, 32], strides = [1, 1]} : vector<8x128xf32> to vector<8x32xf32>
    %143 = vector.extract_strided_slice %140 {offsets = [0, 32], sizes = [8, 32], strides = [1, 1]} : vector<8x128xf32> to vector<8x32xf32>
    %144 = vector.extract_strided_slice %141 {offsets = [0, 64], sizes = [8, 32], strides = [1, 1]} : vector<8x128xf32> to vector<8x32xf32>
    %145 = vector.extract_strided_slice %140 {offsets = [0, 96], sizes = [8, 32], strides = [1, 1]} : vector<8x128xf32> to vector<8x32xf32>
    %146 = arith.mulf %143, %124 : vector<8x32xf32>
    %147 = arith.mulf %142, %144 : vector<8x32xf32>
    %148 = arith.addf %146, %147 : vector<8x32xf32>
    %149 = math.tanh %148 : vector<8x32xf32>
    %150 = arith.mulf %145, %149 : vector<8x32xf32>
    %151 = arith.index_cast %130 : i32 to index
    %c0_49 = arith.constant 0 : index
    %152 = vector.load %arg9[%151, %c0_49] : memref<64x32xf32, #tpu.memory_space<vmem>>, vector<8x32xf32>
    tpu.vector_store %arg9[%151, %c0_49], %150 {strides = array<i32>} : memref<64x32xf32, #tpu.memory_space<vmem>>, vector<8x32xf32>,
    %c6_i32 = arith.constant 6 : i32
    %c8_i32_50 = arith.constant 8 : i32
    %153 = arith.muli %c6_i32, %c8_i32_50 : i32
    %154 = tpu.assume_multiple %153, 8 : i32
    %155 = arith.index_cast %154 : i32 to index
    %c0_51 = arith.constant 0 : index
    %156 = vector.load %arg8[%155, %c0_51] : memref<64x128xf32, #tpu.memory_space<vmem>>, vector<8x128xf32>
    %c0_52 = arith.constant 0 : index
    %c0_53 = arith.constant 0 : index
    %157 = vector.load %arg3[%c0_52, %c0_53] : memref<32x128xf32, #tpu.memory_space<vmem>>, vector<32x128xf32>
    %cst_54 = arith.constant dense<0.000000e+00> : vector<8x128xf32>
    %158 = tpu.matmul %150, %157, %cst_54 {dimension_numbers = #tpu.dot_dimension_numbers<[1], [0], [0], [1], [0, 0, 1, 1], [], []>} : vector<8x32xf32>, vector<32x128xf32>, vector<8x128xf32> -> vector<8x128xf32>
    %159 = arith.addf %156, %158 : vector<8x128xf32>
    %160 = arith.negf %159 : vector<8x128xf32>
    %161 = math.exp %160 : vector<8x128xf32>
    %cst_55 = arith.constant 1.000000e+00 : f32
    %162 = vector.broadcast %cst_55 : f32 to vector<8x128xf32>
    %163 = arith.addf %162, %161 : vector<8x128xf32>
    %164 = arith.divf %162, %163 : vector<8x128xf32>
    %165 = math.tanh %159 : vector<8x128xf32>
    %166 = vector.extract_strided_slice %164 {offsets = [0, 0], sizes = [8, 32], strides = [1, 1]} : vector<8x128xf32> to vector<8x32xf32>
    %167 = vector.extract_strided_slice %164 {offsets = [0, 32], sizes = [8, 32], strides = [1, 1]} : vector<8x128xf32> to vector<8x32xf32>
    %168 = vector.extract_strided_slice %165 {offsets = [0, 64], sizes = [8, 32], strides = [1, 1]} : vector<8x128xf32> to vector<8x32xf32>
    %169 = vector.extract_strided_slice %164 {offsets = [0, 96], sizes = [8, 32], strides = [1, 1]} : vector<8x128xf32> to vector<8x32xf32>
    %170 = arith.mulf %167, %148 : vector<8x32xf32>
    %171 = arith.mulf %166, %168 : vector<8x32xf32>
    %172 = arith.addf %170, %171 : vector<8x32xf32>
    %173 = math.tanh %172 : vector<8x32xf32>
    %174 = arith.mulf %169, %173 : vector<8x32xf32>
    %175 = arith.index_cast %154 : i32 to index
    %c0_56 = arith.constant 0 : index
    %176 = vector.load %arg9[%175, %c0_56] : memref<64x32xf32, #tpu.memory_space<vmem>>, vector<8x32xf32>
    tpu.vector_store %arg9[%175, %c0_56], %174 {strides = array<i32>} : memref<64x32xf32, #tpu.memory_space<vmem>>, vector<8x32xf32>,
    %c7_i32 = arith.constant 7 : i32
    %c8_i32_57 = arith.constant 8 : i32
    %177 = arith.muli %c7_i32, %c8_i32_57 : i32
    %178 = tpu.assume_multiple %177, 8 : i32
    %179 = arith.index_cast %178 : i32 to index
    %c0_58 = arith.constant 0 : index
    %180 = vector.load %arg8[%179, %c0_58] : memref<64x128xf32, #tpu.memory_space<vmem>>, vector<8x128xf32>
    %c0_59 = arith.constant 0 : index
    %c0_60 = arith.constant 0 : index
    %181 = vector.load %arg3[%c0_59, %c0_60] : memref<32x128xf32, #tpu.memory_space<vmem>>, vector<32x128xf32>
    %cst_61 = arith.constant dense<0.000000e+00> : vector<8x128xf32>
    %182 = tpu.matmul %174, %181, %cst_61 {dimension_numbers = #tpu.dot_dimension_numbers<[1], [0], [0], [1], [0, 0, 1, 1], [], []>} : vector<8x32xf32>, vector<32x128xf32>, vector<8x128xf32> -> vector<8x128xf32>
    %183 = arith.addf %180, %182 : vector<8x128xf32>
    %184 = arith.negf %183 : vector<8x128xf32>
    %185 = math.exp %184 : vector<8x128xf32>
    %cst_62 = arith.constant 1.000000e+00 : f32
    %186 = vector.broadcast %cst_62 : f32 to vector<8x128xf32>
    %187 = arith.addf %186, %185 : vector<8x128xf32>
    %188 = arith.divf %186, %187 : vector<8x128xf32>
    %189 = math.tanh %183 : vector<8x128xf32>
    %190 = vector.extract_strided_slice %188 {offsets = [0, 0], sizes = [8, 32], strides = [1, 1]} : vector<8x128xf32> to vector<8x32xf32>
    %191 = vector.extract_strided_slice %188 {offsets = [0, 32], sizes = [8, 32], strides = [1, 1]} : vector<8x128xf32> to vector<8x32xf32>
    %192 = vector.extract_strided_slice %189 {offsets = [0, 64], sizes = [8, 32], strides = [1, 1]} : vector<8x128xf32> to vector<8x32xf32>
    %193 = vector.extract_strided_slice %188 {offsets = [0, 96], sizes = [8, 32], strides = [1, 1]} : vector<8x128xf32> to vector<8x32xf32>
    %194 = arith.mulf %191, %172 : vector<8x32xf32>
    %195 = arith.mulf %190, %192 : vector<8x32xf32>
    %196 = arith.addf %194, %195 : vector<8x32xf32>
    %197 = math.tanh %196 : vector<8x32xf32>
    %198 = arith.mulf %193, %197 : vector<8x32xf32>
    %199 = arith.index_cast %178 : i32 to index
    %c0_63 = arith.constant 0 : index
    %200 = vector.load %arg9[%199, %c0_63] : memref<64x32xf32, #tpu.memory_space<vmem>>, vector<8x32xf32>
    tpu.vector_store %arg9[%199, %c0_63], %198 {strides = array<i32>} : memref<64x32xf32, #tpu.memory_space<vmem>>, vector<8x32xf32>,
    %c8_i32_64 = arith.constant 8 : i32
    %c0_65 = arith.constant 0 : index
    %c0_66 = arith.constant 0 : index
    %201 = vector.load %arg9[%c0_65, %c0_66] : memref<64x32xf32, #tpu.memory_space<vmem>>, vector<64x32xf32>
    %c0_67 = arith.constant 0 : index
    %c0_68 = arith.constant 0 : index
    %202 = vector.load %arg5[%c0_67, %c0_68] : memref<32x128xf32, #tpu.memory_space<vmem>>, vector<32x128xf32>
    %cst_69 = arith.constant dense<0.000000e+00> : vector<64x128xf32>
    %203 = tpu.matmul %201, %202, %cst_69 {dimension_numbers = #tpu.dot_dimension_numbers<[1], [0], [0], [1], [0, 0, 1, 1], [], []>} : vector<64x32xf32>, vector<32x128xf32>, vector<64x128xf32> -> vector<64x128xf32>
    %c0_70 = arith.constant 0 : index
    %c0_71 = arith.constant 0 : index
    %204 = vector.load %arg6[%c0_70, %c0_71] : memref<1x128xf32, #tpu.memory_space<vmem>>, vector<1x128xf32>
    %205 = vector.broadcast %204 : vector<1x128xf32> to vector<64x128xf32>
    %206 = arith.addf %203, %205 : vector<64x128xf32>
    %c0_72 = arith.constant 0 : index
    %c0_73 = arith.constant 0 : index
    %207 = vector.load %arg7[%c0_72, %c0_73] : memref<64x128xf32, #tpu.memory_space<vmem>>, vector<64x128xf32>
    tpu.vector_store %arg7[%c0_72, %c0_73], %206 {strides = array<i32>} : memref<64x128xf32, #tpu.memory_space<vmem>>, vector<64x128xf32>,
    return
  }
  func.func @transform_0(%arg0: i32) -> (i32, i32) {
    %c0_i32 = arith.constant 0 : i32
    %c0_i32_0 = arith.constant 0 : i32
    %c0_i32_1 = arith.constant 0 : i32
    return %c0_i32, %c0_i32_0 : i32, i32
  }
  func.func @transform_1(%arg0: i32) -> (i32, i32) {
    %c0_i32 = arith.constant 0 : i32
    %c0_i32_0 = arith.constant 0 : i32
    %c0_i32_1 = arith.constant 0 : i32
    return %c0_i32, %c0_i32_0 : i32, i32
  }
  func.func @transform_2(%arg0: i32) -> (i32, i32) {
    %c0_i32 = arith.constant 0 : i32
    %c0_i32_0 = arith.constant 0 : i32
    %c0_i32_1 = arith.constant 0 : i32
    return %c0_i32, %c0_i32_0 : i32, i32
  }
  func.func @transform_3(%arg0: i32) -> (i32, i32) {
    %c0_i32 = arith.constant 0 : i32
    %c0_i32_0 = arith.constant 0 : i32
    %c0_i32_1 = arith.constant 0 : i32
    return %c0_i32, %c0_i32_0 : i32, i32
  }
  func.func @transform_4(%arg0: i32) -> (i32, i32) {
    %c0_i32 = arith.constant 0 : i32
    %c0_i32_0 = arith.constant 0 : i32
    %c0_i32_1 = arith.constant 0 : i32
    return %c0_i32, %c0_i32_0 : i32, i32
  }
  func.func @transform_5(%arg0: i32) -> (i32, i32) {
    %c0_i32 = arith.constant 0 : i32
    %c0_i32_0 = arith.constant 0 : i32
    %c0_i32_1 = arith.constant 0 : i32
    return %c0_i32, %c0_i32_0 : i32, i32
  }
  func.func @transform_6(%arg0: i32) -> (i32, i32) {
    %c0_i32 = arith.constant 0 : i32
    %c0_i32_0 = arith.constant 0 : i32
    %c0_i32_1 = arith.constant 0 : i32
    return %c0_i32, %c0_i32_0 : i32, i32
  }
}

</mosaic_0001>

<bundles_post_ra>
// kernel: tpu_custom_call.1
= control target key start
LH: loop header
LB: loop body
LE: loop exit
PB: predicated region body
PF: predicated region fallthrough
CT: control target
= control target key end

     0   :  { %vm41_vm0 = vcmask 130048   ;;  %s1832_s0 = inlined_call_operand.vmem [shape: f32[64,16], index: 0, kind: input, shape index: {}]   ;;  %s1833_s1 = inlined_call_operand.vmem [shape: f32[16,128], index: 1, kind: input, shape index: {}]   ;;  %s1834_s2 = inlined_call_operand.vmem [shape: f32[32,128], index: 2, kind: input, shape index: {}]   ;;  %s1835_s3 = inlined_call_operand.vmem [shape: f32[1,128], index: 3, kind: input, shape index: {}]   ;;  %s1836_s4 = inlined_call_operand.vmem [shape: f32[32,128], index: 4, kind: input, shape index: {}]   ;;  %s1837_s5 = inlined_call_operand.vmem [shape: f32[1,128], index: 5, kind: input, shape index: {}]   ;;  %s1838_s6 = inlined_call_operand.hbm [shape: f32[64,128], index: 6, kind: output, shape index: {}]  }
   0x1   :  { %v33_v0 = vld [vmem:[%s1833_s1 + $0x8] sm:$0xff]  ;;  %v32_v1 = vld [vmem:[%s1833_s1] sm:$0xff]  ;;  %v1597_v4 = vld [vmem:[%s1834_s2 + $0x18] sm:$0xff] }
   0x2   :  { %v28_v2 = vld [vmem:[%s1832_s0 + $0x20] sm:$0xff]  ;;  %1442 = vmatprep.subr.mxu1 %v33_v0  ;;  %1318 = vmatprep.subr.mxu0 %v33_v0  ;;  %v29_v3 = vld [vmem:[%s1832_s0 + $0x28] sm:$0xff] }
   0x3   :  { %1444 = vmatpush3.msra.mxu1 %v33_v0  ;;  %1328 = vmatprep.mubr.msk.f32.mxu1 %vm41_vm0, %v28_v2  ;;  %v24_v5 = vld [vmem:[%s1832_s0] sm:$0xff] }
   0x4   :  { %1443 = vmatprep.subr.mxu1 %v32_v1  ;;  %1319 = vmatpush3.msra.mxu0 %v33_v0 }
   0x5   :  { %1445 = vmatpush3.msra.mxu1 %v32_v1  ;;  %1320 = vmatprep.subr.mxu0 %v32_v1 }
   0x6   :  { %11 = vsyncpa [#allocation5], 0  ;;  %1329 = vmatmul.mubr.msk.f32.vlgmr.msra.gmra.mxu1 %vm41_vm0, %v29_v3  ;;  %v1539_v6 = vmov 0.0   ;;  %v25_v7 = vld [vmem:[%s1832_s0 + $0x8] sm:$0xff]  ;;  %v30_v8 = vld [vmem:[%s1832_s0 + $0x30] sm:$0xff]  ;;  %1321 = vmatpush3.msra.mxu0 %v32_v1  ;;  %vm1540_vm1 = vmmov 0  }
   0x7   :  { %1334 = vmatprep.subr.mxu1 %v1539_v6  ;;  %v1614_v9 = vld [vmem:[%s1834_s2 + $0x10] sm:$0xff]  ;;  %1322 = vmatprep.mubr.msk.f32.mxu0 %vm41_vm0, %v24_v5  ;;  %v31_v10 = vld [vmem:[%s1832_s0 + $0x38] sm:$0xff]  ;;  %v1626_v11 = vld [vmem:[%s1834_s2 + $0x8] sm:$0xff]  ;;  %s1541_s21 = smov 64   ;;  %vm184_vm2 = vcmask 261120  }
   0x8   :  { %1335 = vmatpush3.msra.mxu1 %v1597_v4  ;;  %1323 = vmatmul.mubr.msk.f32.vlgmr.msra.gmra.mxu0 %vm41_vm0, %v25_v7  ;;  %v1635_v12 = vld [vmem:[%s1834_s2] sm:$0xff]  ;;  %v26_v52 = vld [vmem:[%s1832_s0 + $0x10] sm:$0xff]  ;;  %v27_v53 = vld [vmem:[%s1832_s0 + $0x18] sm:$0xff] }
   0x9   :  { %1336 = vmatprep.subr.mxu1 %v1539_v6  ;;  %1331 = vmatprep.mubr.msk.f32.mxu1 %vm41_vm0, %v30_v8  ;;  %v1671_v18 = vld [vmem:[%s1835_s3] ss:$0 sm:$0xff]  ;;  %s1542_s3 = smov 32  }
   0xa   :  { %1337 = vmatpush3.msra.mxu1 %v1614_v9  ;;  %1356 = vmatprep.subr.mxu0 %v1539_v6 }
   0xb   :  { %1332 = vmatmul.mubr.msk.f32.gmra.mxu1 %vm41_vm0, %v31_v10  ;;  %1338 = vmatprep.subr.mxu1 %v1539_v6 }
   0xc   :  { %1339 = vmatpush3.msra.mxu1 %v1626_v11  ;;  %1342 = vmatprep.mubr.msk.f32.mxu1 %vm1540_vm1, %v1539_v6 }
   0xd   :  { %1340 = vmatprep.subr.mxu1 %v1539_v6  ;;  %1357 = vmatpush3.msra.mxu0 %v1597_v4 }
   0xe   :  { %1341 = vmatpush3.msra.mxu1 %v1635_v12  ;;  %1358 = vmatprep.subr.mxu0 %v1539_v6 }
   0xf   :  { %1343 = vmatmul.mubr.f32.vlgmr.msra.gmra.mxu1 %v1539_v6  ;;  %1345 = vmatprep.subr.mxu1 %v1539_v6 }
  0x10   :  { %1346 = vmatpush3.msra.mxu1 %v1597_v4  ;;  %1353 = vmatprep.mubr.msk.f32.mxu1 %vm1540_vm1, %v1539_v6 }
  0x11   :  { %1347 = vmatprep.subr.mxu1 %v1539_v6  ;;  %1359 = vmatpush3.msra.mxu0 %v1614_v9 }
  0x12   :  { %1348 = vmatpush3.msra.mxu1 %v1614_v9  ;;  %1360 = vmatprep.subr.mxu0 %v1539_v6 }
  0x13   :  { %1349 = vmatprep.subr.mxu1 %v1539_v6  ;;  %1361 = vmatpush3.msra.mxu0 %v1626_v11 }
  0x14   :  { %1350 = vmatpush3.msra.mxu1 %v1626_v11  ;;  %1362 = vmatprep.subr.mxu0 %v1539_v6 }
  0x15   :  { %1351 = vmatprep.subr.mxu1 %v1539_v6  ;;  %1363 = vmatpush3.msra.mxu0 %v1635_v12 }
  0x16   :  { %1352 = vmatpush3.msra.mxu1 %v1635_v12  ;;  %1378 = vmatprep.subr.mxu0 %v1539_v6 }
  0x17   :  { %1367 = vmatprep.subr.mxu1 %v1539_v6  ;;  %1325 = vmatprep.mubr.msk.f32.mxu0 %vm41_vm0, %v26_v52 }
  0x18   :  { %1326 = vmatmul.mubr.msk.f32.gmra.mxu0 %vm41_vm0, %v27_v53 }
  0x19   :  { %1364 = vmatprep.mubr.msk.f32.mxu0 %vm1540_vm1, %v1539_v6 }
  0xc6   :  { %v1662_v13 = vpop.f32.mrf.mxu1 }
  0xc8   :  { %v1664_v14 = vpop.f32.mrf.mxu1  ;;  %v1324_v15 = vpop.f32.mrf.mxu0 }
  0xc9   :  { %v138_v38 = vadd.f32 %v1324_v15, %v1671_v18 }
  0xca   :  { %v132_v17 = vpop.f32.mrf.mxu0 }
  0xcb   :  { %v1666_v16 = vpop.f32.mrf.mxu1  ;;  %v133_v20 = vadd.f32 %v1671_v18, %v132_v17 }
  0xcd   :  { %v1673_v19 = vpop.f32.mrf.mxu1 }
  0xcf   :  { %v254_v21 = vpop.f32.mrf.mxu1 }
  0xd0   :  { %v258_v22 = vadd.f32 %v254_v21, %v133_v20 }
  0xd1   :  { %v1344_v23 = vpop.f32.mrf.mxu1 }
  0xd2   :  { %1453 = vtanh.f32 %v258_v22  ;;  %v1232_v25 = vmul.f32 -1.442695, %v258_v22 }
  0xd4   :  { %1455 = vpow2.f32 %v1232_v25 }
  0xd8   :  { %v1327_v58 = vpop.f32.mrf.mxu0 }
  0xda   :  { %v142_v59 = vpop.f32.mrf.mxu0 }
  0xdb   :  { %v143_v60 = vadd.f32 %v1671_v18, %v142_v59  ;;  %v158_v59 = vadd.f32 %v1662_v13, %v1671_v18 }
  0xdf   :  { %v1454_v24 = vpop.eup %1453 }
  0xe0   :  { %268 = vrot.lane.b32.xlu0 %v1454_v24, %s1541_s21  ;;  %v148_v24 = vadd.f32 %v1327_v58, %v1671_v18 }
  0xe1   :  { %v1456_v26 = vpop.eup %1455 }
  0xe2   :  { %v262_v27 = vadd.f32 1.0, %v1456_v26 }
  0xe4   :  { %1457 = vrcp.f32 %v262_v27 }
  0xf1   :  { %v1458_v28 = vpop.eup %1457 }
  0xf2   :  { %v266_v31 = vmul.f32 0.0, %v1458_v28 }
 0x152   :  { %v269_v29 = vpop.permute.xlu0 %268 }
 0x153   :  { %v271_v30 = vmul.f32 %v1458_v28, %v269_v29 }
 0x155   :  { %273 = vrot.lane.b32.xlu0 %v271_v30, %s1542_s3 }
 0x1c7   :  { %v274_v32 = vpop.permute.xlu0 %273 }
 0x1c8   :  { %v276_v33 = vadd.f32 %v274_v32, %v266_v31 }
 0x1ca   :  { %1459 = vtanh.f32 %v276_v33 }
 0x1d7   :  { %v1460_v34 = vpop.eup %1459 }
 0x1d8   :  { %279 = vrot.lane.b32.xlu1 %v1460_v34, %s1541_s21 }
 0x24a   :  { %v280_v35 = vpop.permute.xlu1 %279 }
 0x24b   :  { %v282_v36 = vmul.f32 %v1458_v28, %v280_v35 }
 0x24d   :  { %284 = vrot.lane.b32.xlu1 %v282_v36, %s1542_s3 }
 0x2bf   :  { %v285_v37 = vpop.permute.xlu1 %284 }
 0x2c0   :  { %287 = vst.msk [vmem:[#allocation3] sm:$0xff] %vm184_vm2, %v285_v37  ;;  %1354 = vmatmul.mubr.msk.f32.vlgmr.msra.gmra.mxu1 %vm184_vm2, %v285_v37 }
 0x2c1   :  { %1368 = vmatpush3.msra.mxu1 %v1597_v4  ;;  %1375 = vmatprep.mubr.msk.f32.mxu1 %vm1540_vm1, %v1539_v6 }
 0x2c2   :  { %1369 = vmatprep.subr.mxu1 %v1539_v6 }
 0x2c3   :  { %1370 = vmatpush3.msra.mxu1 %v1614_v9 }
 0x2c4   :  { %1371 = vmatprep.subr.mxu1 %v1539_v6 }
 0x2c5   :  { %1372 = vmatpush3.msra.mxu1 %v1626_v11 }
 0x2c6   :  { %1373 = vmatprep.subr.mxu1 %v1539_v6 }
 0x2c7   :  { %1374 = vmatpush3.msra.mxu1 %v1635_v12 }
 0x2c8   :  { %1389 = vmatprep.subr.mxu1 %v1539_v6 }
 0x380   :  { %v362_v39 = vpop.f32.mrf.mxu1 }
 0x381   :  { %v366_v40 = vadd.f32 %v362_v39, %v138_v38 }
 0x382   :  { %v1355_v41 = vpop.f32.mrf.mxu1 }
 0x383   :  { %1461 = vtanh.f32 %v366_v40  ;;  %v1234_v43 = vmul.f32 -1.442695, %v366_v40 }
 0x385   :  { %1463 = vpow2.f32 %v1234_v43 }
 0x390   :  { %v1462_v42 = vpop.eup %1461 }
 0x391   :  { %376 = vrot.lane.b32.xlu0 %v1462_v42, %s1541_s21  ;;  %v153_v42 = vadd.f32 %v1671_v18, %v1664_v14 }
 0x392   :  { %v1464_v44 = vpop.eup %1463 }
 0x393   :  { %v370_v45 = vadd.f32 1.0, %v1464_v44 }
 0x395   :  { %1465 = vrcp.f32 %v370_v45 }
 0x3a2   :  { %v1466_v46 = vpop.eup %1465 }
 0x3a3   :  { %v374_v49 = vmul.f32 %v1466_v46, %v276_v33 }
 0x403   :  { %v377_v47 = vpop.permute.xlu0 %376 }
 0x404   :  { %v379_v48 = vmul.f32 %v1466_v46, %v377_v47 }
 0x406   :  { %381 = vrot.lane.b32.xlu1 %v379_v48, %s1542_s3 }
 0x478   :  { %v382_v50 = vpop.permute.xlu1 %381 }
 0x479   :  { %v384_v51 = vadd.f32 %v382_v50, %v374_v49 }
 0x47b   :  { %1467 = vtanh.f32 %v384_v51 }
 0x488   :  { %v1468_v54 = vpop.eup %1467 }
 0x489   :  { %387 = vrot.lane.b32.xlu0 %v1468_v54, %s1541_s21 }
 0x4fb   :  { %v388_v55 = vpop.permute.xlu0 %387 }
 0x4fc   :  { %v390_v56 = vmul.f32 %v1466_v46, %v388_v55 }
 0x4fe   :  { %392 = vrot.lane.b32.xlu1 %v390_v56, %s1542_s3 }
 0x570   :  { %v393_v57 = vpop.permute.xlu1 %392 }
 0x571   :  { %396 = vst.msk [vmem:[#allocation3 + $0x8] sm:$0xff] %vm184_vm2, %v393_v57  ;;  %1365 = vmatmul.mubr.msk.f32.vlgmr.msra.gmra.mxu0 %vm184_vm2, %v393_v57 }
 0x572   :  { %1379 = vmatpush3.msra.mxu0 %v1597_v4  ;;  %1386 = vmatprep.mubr.msk.f32.mxu0 %vm1540_vm1, %v1539_v6 }
 0x573   :  { %1380 = vmatprep.subr.mxu0 %v1539_v6 }
 0x574   :  { %1381 = vmatpush3.msra.mxu0 %v1614_v9 }
 0x575   :  { %1382 = vmatprep.subr.mxu0 %v1539_v6 }
 0x576   :  { %1383 = vmatpush3.msra.mxu0 %v1626_v11 }
 0x577   :  { %1384 = vmatprep.subr.mxu0 %v1539_v6 }
 0x578   :  { %1385 = vmatpush3.msra.mxu0 %v1635_v12 }
 0x579   :  { %1400 = vmatprep.subr.mxu0 %v1539_v6 }
 0x631   :  { %v471_v61 = vpop.f32.mrf.mxu0 }
 0x632   :  { %v475_v62 = vadd.f32 %v471_v61, %v143_v60 }
 0x633   :  { %v1366_v63 = vpop.f32.mrf.mxu0 }
 0x634   :  { %1469 = vtanh.f32 %v475_v62  ;;  %v1236_v1 = vmul.f32 -1.442695, %v475_v62 }
 0x636   :  { %1471 = vpow2.f32 %v1236_v1 }
 0x641   :  { %v1470_v0 = vpop.eup %1469 }
 0x642   :  { %485 = vrot.lane.b32.xlu0 %v1470_v0, %s1541_s21 }
 0x643   :  { %v1472_v2 = vpop.eup %1471 }
 0x644   :  { %v479_v3 = vadd.f32 1.0, %v1472_v2 }
 0x646   :  { %1473 = vrcp.f32 %v479_v3  ;;  %v1062_v3 = vld [vmem:[%s1836_s4 + $0x18] sm:$0xff] }
 0x653   :  { %v1474_v5 = vpop.eup %1473 }
 0x654   :  { %v483_v10 = vmul.f32 %v1474_v5, %v384_v51 }
 0x6b4   :  { %v486_v7 = vpop.permute.xlu0 %485 }
 0x6b5   :  { %v488_v8 = vmul.f32 %v1474_v5, %v486_v7 }
 0x6b7   :  { %490 = vrot.lane.b32.xlu1 %v488_v8, %s1542_s3 }
 0x729   :  { %v491_v15 = vpop.permute.xlu1 %490 }
 0x72a   :  { %v493_v17 = vadd.f32 %v491_v15, %v483_v10  ;;  %v1061_v15 = vld [vmem:[%s1836_s4 + $0x10] sm:$0xff] }
 0x72c   :  { %1475 = vtanh.f32 %v493_v17 }
 0x739   :  { %v1476_v20 = vpop.eup %1475 }
 0x73a   :  { %496 = vrot.lane.b32.xlu0 %v1476_v20, %s1541_s21  ;;  %v1060_v20 = vld [vmem:[%s1836_s4 + $0x8] sm:$0xff] }
 0x7ac   :  { %v497_v21 = vpop.permute.xlu0 %496 }
 0x7ad   :  { %v499_v22 = vmul.f32 %v1474_v5, %v497_v21  ;;  %v1059_v21 = vld [vmem:[%s1836_s4] sm:$0xff] }
 0x7af   :  { %501 = vrot.lane.b32.xlu1 %v499_v22, %s1542_s3  ;;  %v1052_v22 = vld [vmem:[#allocation3 + $0x8] sm:$0xff] }
 0x821   :  { %v502_v23 = vpop.permute.xlu1 %501 }
 0x822   :  { %505 = vst.msk [vmem:[#allocation3 + $0x10] sm:$0xff] %vm184_vm2, %v502_v23  ;;  %1376 = vmatmul.mubr.msk.f32.vlgmr.msra.gmra.mxu1 %vm184_vm2, %v502_v23 }
 0x823   :  { %1390 = vmatpush3.msra.mxu1 %v1597_v4  ;;  %1397 = vmatprep.mubr.msk.f32.mxu1 %vm1540_vm1, %v1539_v6 }
 0x824   :  { %1391 = vmatprep.subr.mxu1 %v1539_v6 }
 0x825   :  { %1392 = vmatpush3.msra.mxu1 %v1614_v9 }
 0x826   :  { %1393 = vmatprep.subr.mxu1 %v1539_v6 }
 0x827   :  { %1394 = vmatpush3.msra.mxu1 %v1626_v11 }
 0x828   :  { %1395 = vmatprep.subr.mxu1 %v1539_v6 }
 0x829   :  { %1396 = vmatpush3.msra.mxu1 %v1635_v12  ;;  %v1053_v23 = vld [vmem:[#allocation3 + $0x10] sm:$0xff] }
 0x82a   :  { %1411 = vmatprep.subr.mxu1 %v1539_v6 }
 0x8e2   :  { %v580_v25 = vpop.f32.mrf.mxu1 }
 0x8e3   :  { %v584_v26 = vadd.f32 %v580_v25, %v148_v24 }
 0x8e4   :  { %v1377_v27 = vpop.f32.mrf.mxu1 }
 0x8e5   :  { %1477 = vtanh.f32 %v584_v26  ;;  %v1238_v29 = vmul.f32 -1.442695, %v584_v26  ;;  %v163_v27 = vadd.f32 %v1671_v18, %v1673_v19 }
 0x8e7   :  { %1479 = vpow2.f32 %v1238_v29 }
 0x8f2   :  { %v1478_v28 = vpop.eup %1477 }
 0x8f3   :  { %594 = vrot.lane.b32.xlu0 %v1478_v28, %s1541_s21 }
 0x8f4   :  { %v1480_v30 = vpop.eup %1479 }
 0x8f5   :  { %v588_v31 = vadd.f32 1.0, %v1480_v30 }
 0x8f7   :  { %1481 = vrcp.f32 %v588_v31  ;;  %v1803_v31 = vld [vmem:[%s1837_s5] ss:$0 sm:$0xff]  ;;  %s1543_s5 = smov [#allocation4]  }
 0x8f8   :  { %s1212_s9 = sshll.u32 %s1543_s5, 4  ;;  %s1213_s9 = int_to_ptr.vmem [resolvable:$true] %s1212_s9 }
 0x8f9   :  { %s1517_s10 = scalar_lea.vmem %s1213_s9, 1024  ;;  %p1522_p1 = scmp.lt.s32.totalorder %s1213_s9, %s1213_s9 }
 0x8fa   :  { %p1518_p0 = scmp.ne.s32.totalorder %s1213_s9, %s1517_s10  ;;  %p1523_p2 = scmp.lt.s32.totalorder %s1517_s10, %s1517_s10 }
 0x8fc   :  { %p1524_p3 = por %p1523_p2, %p1522_p1 }
 0x8fe   :  { %p1525_p4 = pnand %p1524_p3, %p1518_p0 }
 0x904   :  { %v1482_v32 = vpop.eup %1481 }
 0x905   :  { %v592_v35 = vmul.f32 %v1482_v32, %v493_v17  ;;  %v1051_v17 = vld [vmem:[#allocation3] sm:$0xff] }
 0x965   :  { %v595_v33 = vpop.permute.xlu0 %594 }
 0x966   :  { %v597_v34 = vmul.f32 %v1482_v32, %v595_v33 }
 0x968   :  { %599 = vrot.lane.b32.xlu1 %v597_v34, %s1542_s3 }
 0x9da   :  { %v600_v36 = vpop.permute.xlu1 %599 }
 0x9db   :  { %v602_v37 = vadd.f32 %v600_v36, %v592_v35 }
 0x9dd   :  { %1483 = vtanh.f32 %v602_v37 }
 0x9ea   :  { %v1484_v38 = vpop.eup %1483 }
 0x9eb   :  { %605 = vrot.lane.b32.xlu0 %v1484_v38, %s1541_s21 }
 0xa5d   :  { %v606_v39 = vpop.permute.xlu0 %605 }
 0xa5e   :  { %v608_v40 = vmul.f32 %v1482_v32, %v606_v39 }
 0xa60   :  { %610 = vrot.lane.b32.xlu1 %v608_v40, %s1542_s3 }
 0xad2   :  { %v611_v41 = vpop.permute.xlu1 %610 }
 0xad3   :  { %614 = vst.msk [vmem:[#allocation3 + $0x18] sm:$0xff] %vm184_vm2, %v611_v41  ;;  %1387 = vmatmul.mubr.msk.f32.vlgmr.msra.gmra.mxu0 %vm184_vm2, %v611_v41 }
 0xad4   :  { %1401 = vmatpush3.msra.mxu0 %v1597_v4  ;;  %1408 = vmatprep.mubr.msk.f32.mxu0 %vm1540_vm1, %v1539_v6 }
 0xad5   :  { %1402 = vmatprep.subr.mxu0 %v1539_v6 }
 0xad6   :  { %1403 = vmatpush3.msra.mxu0 %v1614_v9 }
 0xad7   :  { %1404 = vmatprep.subr.mxu0 %v1539_v6 }
 0xad8   :  { %1405 = vmatpush3.msra.mxu0 %v1626_v11 }
 0xad9   :  { %1406 = vmatprep.subr.mxu0 %v1539_v6 }
 0xada   :  { %1407 = vmatpush3.msra.mxu0 %v1635_v12  ;;  %v1054_v24 = vld [vmem:[#allocation3 + $0x18] sm:$0xff] }
 0xadb   :  { %1422 = vmatprep.subr.mxu0 %v1062_v3 }
 0xb93   :  { %v689_v43 = vpop.f32.mrf.mxu0 }
 0xb94   :  { %v693_v44 = vadd.f32 %v689_v43, %v153_v42 }
 0xb95   :  { %v1388_v45 = vpop.f32.mrf.mxu0 }
 0xb96   :  { %1485 = vtanh.f32 %v693_v44  ;;  %v1240_v47 = vmul.f32 -1.442695, %v693_v44 }
 0xb98   :  { %1487 = vpow2.f32 %v1240_v47 }
 0xba3   :  { %v1486_v46 = vpop.eup %1485 }
 0xba4   :  { %703 = vrot.lane.b32.xlu0 %v1486_v46, %s1541_s21 }
 0xba5   :  { %v1488_v48 = vpop.eup %1487 }
 0xba6   :  { %v697_v49 = vadd.f32 1.0, %v1488_v48 }
 0xba8   :  { %1489 = vrcp.f32 %v697_v49 }
 0xbb5   :  { %v1490_v50 = vpop.eup %1489 }
 0xbb6   :  { %v701_v53 = vmul.f32 %v1490_v50, %v602_v37 }
 0xc16   :  { %v704_v51 = vpop.permute.xlu0 %703 }
 0xc17   :  { %v706_v52 = vmul.f32 %v1490_v50, %v704_v51 }
 0xc19   :  { %708 = vrot.lane.b32.xlu1 %v706_v52, %s1542_s3 }
 0xc8b   :  { %v709_v54 = vpop.permute.xlu1 %708 }
 0xc8c   :  { %v711_v14 = vadd.f32 %v709_v54, %v701_v53 }
 0xc8e   :  { %1491 = vtanh.f32 %v711_v14 }
 0xc9b   :  { %v1492_v55 = vpop.eup %1491 }
 0xc9c   :  { %714 = vrot.lane.b32.xlu0 %v1492_v55, %s1541_s21 }
 0xd0e   :  { %v715_v56 = vpop.permute.xlu0 %714 }
 0xd0f   :  { %v717_v57 = vmul.f32 %v1490_v50, %v715_v56 }
 0xd11   :  { %719 = vrot.lane.b32.xlu1 %v717_v57, %s1542_s3  ;;  %v168_v57 = vadd.f32 %v1666_v16, %v1671_v18 }
 0xd83   :  { %v720_v58 = vpop.permute.xlu1 %719 }
 0xd84   :  { %723 = vst.msk [vmem:[#allocation3 + $0x20] sm:$0xff] %vm184_vm2, %v720_v58  ;;  %1398 = vmatmul.mubr.msk.f32.vlgmr.msra.gmra.mxu1 %vm184_vm2, %v720_v58 }
 0xd85   :  { %1412 = vmatpush3.msra.mxu1 %v1597_v4  ;;  %1419 = vmatprep.mubr.msk.f32.mxu1 %vm1540_vm1, %v1539_v6 }
 0xd86   :  { %1413 = vmatprep.subr.mxu1 %v1539_v6 }
 0xd87   :  { %1414 = vmatpush3.msra.mxu1 %v1614_v9 }
 0xd88   :  { %1415 = vmatprep.subr.mxu1 %v1539_v6 }
 0xd89   :  { %1416 = vmatpush3.msra.mxu1 %v1626_v11 }
 0xd8a   :  { %1417 = vmatprep.subr.mxu1 %v1539_v6 }
 0xd8b   :  { %1418 = vmatpush3.msra.mxu1 %v1635_v12  ;;  %v1055_v25 = vld [vmem:[#allocation3 + $0x20] sm:$0xff] }
 0xe44   :  { %v798_v60 = vpop.f32.mrf.mxu1 }
 0xe45   :  { %v802_v4 = vadd.f32 %v798_v60, %v158_v59 }
 0xe46   :  { %v1399_v61 = vpop.f32.mrf.mxu1 }
 0xe47   :  { %1493 = vtanh.f32 %v802_v4  ;;  %v1242_v63 = vmul.f32 -1.442695, %v802_v4 }
 0xe49   :  { %1495 = vpow2.f32 %v1242_v63 }
 0xe54   :  { %v1494_v62 = vpop.eup %1493 }
 0xe55   :  { %812 = vrot.lane.b32.xlu0 %v1494_v62, %s1541_s21 }
 0xe56   :  { %v1496_v9 = vpop.eup %1495 }
 0xe57   :  { %v806_v0 = vadd.f32 1.0, %v1496_v9 }
 0xe59   :  { %1497 = vrcp.f32 %v806_v0 }
 0xe66   :  { %v1498_v11 = vpop.eup %1497 }
 0xe67   :  { %v810_v12 = vmul.f32 %v1498_v11, %v711_v14 }
 0xec7   :  { %v813_v1 = vpop.permute.xlu0 %812 }
 0xec8   :  { %v815_v6 = vmul.f32 %v1498_v11, %v813_v1 }
 0xeca   :  { %817 = vrot.lane.b32.xlu1 %v815_v6, %s1542_s3 }
 0xf3c   :  { %v818_v2 = vpop.permute.xlu1 %817 }
 0xf3d   :  { %v1773_v13 = vadd.f32 %v818_v2, %v810_v12 }
 0xf3f   :  { %1499 = vtanh.f32 %v1773_v13 }
 0xf4c   :  { %v1500_v5 = vpop.eup %1499 }
 0xf4d   :  { %823 = vrot.lane.b32.xlu0 %v1500_v5, %s1541_s21 }
 0xfbf   :  { %v824_v7 = vpop.permute.xlu0 %823 }
 0xfc0   :  { %v826_v8 = vmul.f32 %v1498_v11, %v824_v7 }
 0xfc2   :  { %828 = vrot.lane.b32.xlu1 %v826_v8, %s1542_s3 }
0x1034   :  { %v829_v10 = vpop.permute.xlu1 %828 }
0x1035   :  { %832 = vst.msk [vmem:[#allocation3 + $0x28] sm:$0xff] %vm184_vm2, %v829_v10  ;;  %1409 = vmatmul.mubr.msk.f32.vlgmr.msra.gmra.mxu0 %vm184_vm2, %v829_v10 }
0x1036   :  { %1423 = vmatpush3.msra.mxu0 %v1062_v3  ;;  %1430 = vmatprep.mubr.msk.f32.mxu0 %vm184_vm2, %v1051_v17 }
0x1037   :  { %1424 = vmatprep.subr.mxu0 %v1061_v15 }
0x1038   :  { %1425 = vmatpush3.msra.mxu0 %v1061_v15 }
0x1039   :  { %1426 = vmatprep.subr.mxu0 %v1060_v20 }
0x103a   :  { %1427 = vmatpush3.msra.mxu0 %v1060_v20 }
0x103b   :  { %1428 = vmatprep.subr.mxu0 %v1059_v21 }
0x103c   :  { %1429 = vmatpush3.msra.mxu0 %v1059_v21  ;;  %v1056_v26 = vld [vmem:[#allocation3 + $0x28] sm:$0xff] }
0x103d   :  { %1431 = vmatmul.mubr.msk.f32.vlgmr.msra.gmra.mxu0 %vm184_vm2, %v1052_v22 }
0x103e   :  { %1433 = vmatprep.mubr.msk.f32.mxu0 %vm184_vm2, %v1053_v23 }
0x1041   :  { %1434 = vmatmul.mubr.msk.f32.gmra.mxu0 %vm184_vm2, %v1054_v24 }
0x1042   :  { %1436 = vmatprep.mubr.msk.f32.mxu0 %vm184_vm2, %v1055_v25 }
0x1045   :  { %1437 = vmatmul.mubr.msk.f32.gmra.mxu0 %vm184_vm2, %v1056_v26 }
0x10f5   :  { %v907_v28 = vpop.f32.mrf.mxu0 }
0x10f6   :  { %v911_v29 = vadd.f32 %v907_v28, %v163_v27 }
0x10f7   :  { %v1410_v30 = vpop.f32.mrf.mxu0 }
0x10f8   :  { %1501 = vtanh.f32 %v911_v29  ;;  %v1244_v44 = vmul.f32 -1.442695, %v911_v29 }
0x10fa   :  { %1503 = vpow2.f32 %v1244_v44 }
0x10fd   :  { %v1432_v32 = vpop.f32.mrf.mxu0 }
0x10fe   :  { %v1166_v33 = vadd.f32 %v1432_v32, %v1803_v31 }
0x10ff   :  { %v1160_v34 = vpop.f32.mrf.mxu0 }
0x1100   :  { %1200 = vst [vmem:[#allocation4 + $0x8] sm:$0xff] %v1166_v33  ;;  %v1161_v35 = vadd.f32 %v1803_v31, %v1160_v34 }
0x1101   :  { %v1435_v36 = vpop.f32.mrf.mxu0 }
0x1102   :  { %1199 = vst [vmem:[#allocation4] sm:$0xff] %v1161_v35  ;;  %v1176_v19 = vadd.f32 %v1435_v36, %v1803_v31 }
0x1103   :  { %v1170_v37 = vpop.f32.mrf.mxu0 }
0x1104   :  { %1202 = vst [vmem:[#allocation4 + $0x18] sm:$0xff] %v1176_v19  ;;  %v1171_v38 = vadd.f32 %v1803_v31, %v1170_v37 }
0x1105   :  { %v1502_v39 = vpop.eup %1501  ;;  %v1438_v40 = vpop.f32.mrf.mxu0 }
0x1106   :  { %1201 = vst [vmem:[#allocation4 + $0x10] sm:$0xff] %v1171_v38  ;;  %v1186_v41 = vadd.f32 %v1438_v40, %v1803_v31  ;;  %921 = vrot.lane.b32.xlu0 %v1502_v39, %s1541_s21 }
0x1107   :  { %v1180_v42 = vpop.f32.mrf.mxu0  ;;  %v1504_v45 = vpop.eup %1503 }
0x1108   :  { %1204 = vst [vmem:[#allocation4 + $0x28] sm:$0xff] %v1186_v41  ;;  %v1181_v43 = vadd.f32 %v1803_v31, %v1180_v42  ;;  %v915_v46 = vadd.f32 1.0, %v1504_v45 }
0x110a   :  { %1203 = vst [vmem:[#allocation4 + $0x20] sm:$0xff] %v1181_v43  ;;  %1505 = vrcp.f32 %v915_v46 }
0x1117   :  { %v1506_v47 = vpop.eup %1505 }
0x1118   :  { %v919_v50 = vmul.f32 %v1506_v47, %v1773_v13 }
0x1178   :  { %v922_v48 = vpop.permute.xlu0 %921 }
0x1179   :  { %v924_v49 = vmul.f32 %v1506_v47, %v922_v48 }
0x117b   :  { %926 = vrot.lane.b32.xlu1 %v924_v49, %s1542_s3 }
0x11ed   :  { %v927_v51 = vpop.permute.xlu1 %926 }
0x11ee   :  { %v929_v52 = vadd.f32 %v927_v51, %v919_v50 }
0x11f0   :  { %1507 = vtanh.f32 %v929_v52 }
0x11fd   :  { %v1508_v53 = vpop.eup %1507 }
0x11fe   :  { %932 = vrot.lane.b32.xlu0 %v1508_v53, %s1541_s21 }
0x1270   :  { %v933_v54 = vpop.permute.xlu0 %932 }
0x1271   :  { %v935_v14 = vmul.f32 %v1506_v47, %v933_v54 }
0x1273   :  { %937 = vrot.lane.b32.xlu1 %v935_v14, %s1542_s3 }
0x12e5   :  { %v938_v55 = vpop.permute.xlu1 %937 }
0x12e6   :  { %941 = vst.msk [vmem:[#allocation3 + $0x30] sm:$0xff] %vm184_vm2, %v938_v55  ;;  %1420 = vmatmul.mubr.msk.f32.vlgmr.msra.gmra.mxu1 %vm184_vm2, %v938_v55 }
0x12ed   :  { %v1057_v56 = vld [vmem:[#allocation3 + $0x30] sm:$0xff] }
0x12ee   :  { %1439 = vmatprep.mubr.msk.f32.mxu0 %vm184_vm2, %v1057_v56 }
0x13a6   :  { %v1016_v58 = vpop.f32.mrf.mxu1 }
0x13a7   :  { %v1020_v59 = vadd.f32 %v1016_v58, %v168_v57 }
0x13a8   :  { %v1421_v60 = vpop.f32.mrf.mxu1 }
0x13a9   :  { %1509 = vtanh.f32 %v1020_v59  ;;  %v1246_v61 = vmul.f32 -1.442695, %v1020_v59 }
0x13ab   :  { %1511 = vpow2.f32 %v1246_v61 }
0x13b6   :  { %v1510_v4 = vpop.eup %1509 }
0x13b7   :  { %1030 = vrot.lane.b32.xlu0 %v1510_v4, %s1541_s21 }
0x13b8   :  { %v1512_v62 = vpop.eup %1511 }
0x13b9   :  { %v1024_v63 = vadd.f32 1.0, %v1512_v62 }
0x13bb   :  { %1513 = vrcp.f32 %v1024_v63 }
0x13c8   :  { %v1514_v9 = vpop.eup %1513 }
0x13c9   :  { %v1028_v1 = vmul.f32 %v1514_v9, %v929_v52 }
0x1429   :  { %v1031_v0 = vpop.permute.xlu0 %1030 }
0x142a   :  { %v1033_v11 = vmul.f32 %v1514_v9, %v1031_v0 }
0x142c   :  { %1035 = vrot.lane.b32.xlu1 %v1033_v11, %s1542_s3 }
0x149e   :  { %v1036_v6 = vpop.permute.xlu1 %1035 }
0x149f   :  { %v1038_v16 = vadd.f32 %v1036_v6, %v1028_v1 }
0x14a1   :  { %1515 = vtanh.f32 %v1038_v16 }
0x14ae   :  { %v1516_v18 = vpop.eup %1515 }
0x14af   :  { %1041 = vrot.lane.b32.xlu0 %v1516_v18, %s1541_s21 }
0x1521   :  { %v1042_v12 = vpop.permute.xlu0 %1041 }
0x1522   :  { %v1044_v2 = vmul.f32 %v1514_v9, %v1042_v12 }
0x1524   :  { %1046 = vrot.lane.b32.xlu1 %v1044_v2, %s1542_s3 }
0x1596   :  { %v1047_v13 = vpop.permute.xlu1 %1046 }
0x1597   :  { %1050 = vst.msk [vmem:[#allocation3 + $0x38] sm:$0xff] %vm184_vm2, %v1047_v13 }
0x159e   :  { %v1058_v3 = vld [vmem:[#allocation3 + $0x38] sm:$0xff] }
0x159f   :  { %1440 = vmatmul.mubr.msk.f32.gmra.mxu0 %vm184_vm2, %v1058_v3 }
0x165f   :  { %v1441_v5 = vpop.f32.mrf.mxu0 }
0x1660   :  { %v1196_v7 = vadd.f32 %v1441_v5, %v1803_v31 }
0x1661   :  { %v1190_v8 = vpop.f32.mrf.mxu0 }
0x1662   :  { %1206 = vst [vmem:[#allocation4 + $0x38] sm:$0xff] %v1196_v7  ;;  %v1191_v10 = vadd.f32 %v1803_v31, %v1190_v8 }
0x1664   :  { %1205 = vst [vmem:[#allocation4 + $0x30] sm:$0xff] %v1191_v10 }
0x1665   :  { %1528 = shalt.err (!%p1525_p4)
}
0x1666   :  { %s1544_s11 = smov 128   ;;  %s1545_s12 = smov 8  }
0x1667   :  { %1218 = dma.vmem_to_hbm [thread:$0]  %s1213_s9, 1024, %s1838_s6, [#allocation5], %s1544_s11, %s1544_s11, %s1545_s12  }
0x1668   :  { %1537 = dma.done.wait [#allocation5], 1024  }
0x1669   :  { %1538 = vsyncadd [#allocation5], 4294966272 }
0x166a   :  { %1222 = vsyncpa [#allocation5], 1 }

</bundles_post_ra>
